<compile_context>
chip_gen: v5e
topology: v5e:2x2
jax: 0.10.0
libtpu: 0.0.40
codegen_flags: <defaults>
</compile_context>

<pallas_src>
import functools

import numpy as np
import jax
import jax.numpy as jnp
from jax import lax
from jax.experimental import pallas as pl
from jax.experimental.pallas import tpu as pltpu

WIN_SIZE = 11
WIN_SIGMA = 1.5
DATA_RANGE = 1.0
C1 = (0.01 * DATA_RANGE) ** 2
C2 = (0.03 * DATA_RANGE) ** 2
ALPHA = 0.5


def _round_up(x, m):
    return (x + m - 1) // m * m


def _gaussian_window(size=WIN_SIZE, sigma=WIN_SIGMA):
    coords = np.arange(size, dtype=np.float64) - size // 2
    g = np.exp(-(coords ** 2) / (2.0 * sigma ** 2))
    g /= g.sum()
    return g.astype(np.float32)


def _filter_matrices(h, w, tn, win=WIN_SIZE):
    """Gr_pad (Ho_pad, H) and block-diag Gc (5*TN*W, 5*TN*Wo) so that
    (Gr_pad @ A) @ Gc_bd == valid 2D correlation with g (x) g, per lane block."""
    g = _gaussian_window(win)
    ho, wo = h - win + 1, w - win + 1
    ho_pad = _round_up(ho, 8)
    gr = np.zeros((ho_pad, h), np.float32)          # zero rows beyond ho
    for i in range(ho):
        gr[i, i:i + win] = g
    gc = np.zeros((w, wo), np.float32)
    for j in range(wo):
        gc[j:j + win, j] = g
    gc_bd = np.kron(np.eye(5 * tn, dtype=np.float32), gc)   # (5*tn*W, 5*tn*Wo)
    return jnp.asarray(gr), jnp.asarray(gc_bd)


def _ssim_mse_kernel(x_ref, y_ref, pr_ref, tr_ref, gr_ref, gc_ref,
                     mse_ref, ssim_ref, *, tn, ho, wo, n_true):
    i = pl.program_id(0)

    x = x_ref[0].astype(jnp.float32)      # (H, tn*W)  channel 0, pred
    y = y_ref[0].astype(jnp.float32)      # (H, tn*W)  channel 0, target
    pr = pr_ref[0].astype(jnp.float32)    # (tn, R_pad) remaining channels, pred
    tr = tr_ref[0].astype(jnp.float32)    # (tn, R_pad) remaining channels, target

    # ---- MSE over all channels of this frame block (zero padding cancels) ----
    d0 = x - y
    dr = pr - tr
    mse_ref[0, 0] = jnp.sum(d0 * d0) + jnp.sum(dr * dr)

    # ---- SSIM on channel 0: fused separable Gaussian filtering of
    #      [x, y, x*x, y*y, x*y] for all tn frames as two MXU matmuls ----
    a = jnp.concatenate([x, y, x * x, y * y, x * y], axis=1)       # (H, 5*tn*W)
    gra = jnp.dot(gr_ref[...], a, preferred_element_type=jnp.float32)
    f = jnp.dot(gra, gc_ref[...], preferred_element_type=jnp.float32)  # (Ho_pad, 5*tn*wo)

    g = tn * wo
    mu1, mu2 = f[:, 0:g], f[:, g:2 * g]
    fxx, fyy, fxy = f[:, 2 * g:3 * g], f[:, 3 * g:4 * g], f[:, 4 * g:5 * g]
    mu1_sq = mu1 * mu1
    mu2_sq = mu2 * mu2
    mu1_mu2 = mu1 * mu2
    sigma1_sq = fxx - mu1_sq
    sigma2_sq = fyy - mu2_sq
    sigma12 = fxy - mu1_mu2

    cs_map = (2.0 * sigma12 + C2) / (sigma1_sq + sigma2_sq + C2)
    ssim_map = ((2.0 * mu1_mu2 + C1) / (mu1_sq + mu2_sq + C1)) * cs_map

    # Mask out zero-padded Gr rows and zero-padded tail frames (last block).
    rows = lax.broadcasted_iota(jnp.int32, ssim_map.shape, 0)
    lanes = lax.broadcasted_iota(jnp.int32, ssim_map.shape, 1)
    valid_lanes = jnp.minimum(n_true - i * tn, tn) * wo
    mask = (rows < ho) & (lanes < valid_lanes)
    ssim_ref[0, 0] = jnp.sum(jnp.where(mask, ssim_map, 0.0))


def ssim_mse_loss(pred, target, alpha=ALPHA, tn=None):
    B, T, C, H, W = pred.shape
    assert H >= WIN_SIZE and W >= WIN_SIZE
    N = B * T
    ho, wo = H - WIN_SIZE + 1, W - WIN_SIZE + 1
    ho_pad = _round_up(ho, 8)

    if tn is None:                        # frames per grid step
        tn = max(1, min(N, 256 // W))
    nb = -(-N // tn)                      # number of grid steps
    n_pad = nb * tn

    p4 = pred.reshape(N, C, H, W)
    t4 = target.reshape(N, C, H, W)
    if n_pad != N:                        # pad tail frames with zeros
        pad = ((0, n_pad - N), (0, 0), (0, 0), (0, 0))
        p4 = jnp.pad(p4, pad)
        t4 = jnp.pad(t4, pad)

    # Channel 0 in lane-dense layout: (nb, H, tn*W), frames packed along lanes.
    def chan0(a):
        return (a[:, 0].reshape(nb, tn, H, W)
                .transpose(0, 2, 1, 3)
                .reshape(nb, H, tn * W))

    x_all = chan0(p4)
    y_all = chan0(t4)

    # Remaining channels, flattened lane-dense: (nb, tn, r_pad).
    r = (C - 1) * H * W
    r_pad = max(_round_up(max(r, 1), 128), 128)

    def rest(a):
        if C > 1:
            v = a[:, 1:].reshape(nb, tn, r)
            if r_pad != r:
                v = jnp.pad(v, ((0, 0), (0, 0), (0, r_pad - r)))
            return v
        return jnp.zeros((nb, tn, r_pad), a.dtype)

    p_rest = rest(p4)
    t_rest = rest(t4)

    gr, gc_bd = _filter_matrices(H, W, tn)

    kernel = functools.partial(_ssim_mse_kernel, tn=tn, ho=ho, wo=wo, n_true=N)

    mse_parts, ssim_parts = pl.pallas_call(
        kernel,
        out_shape=(jax.ShapeDtypeStruct((nb, 1), jnp.float32),
                   jax.ShapeDtypeStruct((nb, 1), jnp.float32)),
        grid_spec=pltpu.PrefetchScalarGridSpec(
            num_scalar_prefetch=0,
            grid=(nb,),
            in_specs=[
                pl.BlockSpec((1, H, tn * W), lambda i: (i, 0, 0)),
                pl.BlockSpec((1, H, tn * W), lambda i: (i, 0, 0)),
                pl.BlockSpec((1, tn, r_pad), lambda i: (i, 0, 0)),
                pl.BlockSpec((1, tn, r_pad), lambda i: (i, 0, 0)),
                pl.BlockSpec((ho_pad, H), lambda i: (0, 0)),
                pl.BlockSpec((5 * tn * W, 5 * tn * wo), lambda i: (0, 0)),
            ],
            out_specs=(
                pl.BlockSpec((1, 1), lambda i: (i, 0),
                             memory_space=pltpu.MemorySpace.SMEM),
                pl.BlockSpec((1, 1), lambda i: (i, 0),
                             memory_space=pltpu.MemorySpace.SMEM),
            ),
        ),
        compiler_params=pltpu.CompilerParams(
            dimension_semantics=("parallel",)),
    )(x_all, y_all, p_rest, t_rest, gr, gc_bd)

    mse = jnp.sum(mse_parts) / (B * T * C * H * W)
    ssim_mean = jnp.sum(ssim_parts) / (N * ho * wo)
    return alpha * mse + (1.0 - alpha) * (1.0 - ssim_mean)


def _reference(pred, target, alpha=ALPHA):
    """Pure-JAX reference (uses lax.conv for the Gaussian filtering)."""
    B, T, C, H, W = pred.shape
    mse = jnp.mean((pred - target) ** 2)
    x = pred[:, :, 0].reshape(-1, 1, H, W)
    y = target[:, :, 0].reshape(-1, 1, H, W)
    g = jnp.asarray(_gaussian_window())
    win = jnp.outer(g, g)[None, None]  # (1, 1, 11, 11)

    def filt(a):
        return lax.conv_general_dilated(
            a, win, (1, 1), "VALID",
            dimension_numbers=("NCHW", "OIHW", "NCHW"))

    mu1, mu2 = filt(x), filt(y)
    mu1_sq, mu2_sq, mu1_mu2 = mu1 * mu1, mu2 * mu2, mu1 * mu2
    s1 = filt(x * x) - mu1_sq
    s2 = filt(y * y) - mu2_sq
    s12 = filt(x * y) - mu1_mu2
    cs = (2 * s12 + C2) / (s1 + s2 + C2)
    ssim_map = ((2 * mu1_mu2 + C1) / (mu1_sq + mu2_sq + C1)) * cs
    ssim_val = jnp.mean(ssim_map)
    return alpha * mse + (1.0 - alpha) * (1.0 - ssim_val)


if __name__ == "__main__":
    key = jax.random.PRNGKey(0)
    k1, k2 = jax.random.split(key)
    B, T, C, H, W = 2, 2, 3, 16, 16
    pred = jax.random.uniform(k1, (B, T, C, H, W), dtype=jnp.float32)
    target = jax.random.uniform(k2, (B, T, C, H, W), dtype=jnp.float32)

    loss = jax.block_until_ready(ssim_mse_loss(pred, target))
    ref = jax.block_until_ready(_reference(pred, target))
    assert jnp.allclose(loss, ref, rtol=1e-4, atol=1e-5), (loss, ref)
    print("KERNEL_OK")
</pallas_src>

<mosaic_0001>
module attributes {stable_mosaic.version = 11 : i64} {
  func.func @_ssim_mse_kernel(%arg0: i32, %arg1: memref<1x16x64xf32, #tpu.memory_space<vmem>>, %arg2: memref<1x16x64xf32, #tpu.memory_space<vmem>>, %arg3: memref<1x4x512xf32, #tpu.memory_space<vmem>>, %arg4: memref<1x4x512xf32, #tpu.memory_space<vmem>>, %arg5: memref<8x16xf32, #tpu.memory_space<vmem>>, %arg6: memref<320x120xf32, #tpu.memory_space<vmem>>, %arg7: memref<1x1xf32, #tpu.memory_space<smem>>, %arg8: memref<1x1xf32, #tpu.memory_space<smem>>) attributes {dimension_semantics = [#tpu.dimension_semantics<parallel>], iteration_bounds = array<i64: 1>, scalar_prefetch = 0 : i64, scratch_operands = 0 : i64, tpu.core_type = #tpu.core_type<tc>, window_params = [{transform_indices = @transform_0, window_bounds = array<i64: 1, 16, 64>}, {transform_indices = @transform_1, window_bounds = array<i64: 1, 16, 64>}, {transform_indices = @transform_2, window_bounds = array<i64: 1, 4, 512>}, {transform_indices = @transform_3, window_bounds = array<i64: 1, 4, 512>}, {pipeline_mode = #tpu.pipeline_mode<synchronous>, transform_indices = @transform_4, window_bounds = array<i64: 8, 16>}, {pipeline_mode = #tpu.pipeline_mode<synchronous>, transform_indices = @transform_5, window_bounds = array<i64: 320, 120>}, {transform_indices = @transform_6, window_bounds = array<i64: 1, 1>}, {transform_indices = @transform_7, window_bounds = array<i64: 1, 1>}]} {
    %c0 = arith.constant 0 : index
    %c0_0 = arith.constant 0 : index
    %c0_1 = arith.constant 0 : index
    %0 = vector.load %arg1[%c0, %c0_0, %c0_1] : memref<1x16x64xf32, #tpu.memory_space<vmem>>, vector<1x16x64xf32>
    %1 = vector.shape_cast %0 : vector<1x16x64xf32> to vector<16x64xf32>
    %c0_2 = arith.constant 0 : index
    %c0_3 = arith.constant 0 : index
    %c0_4 = arith.constant 0 : index
    %2 = vector.load %arg2[%c0_2, %c0_3, %c0_4] : memref<1x16x64xf32, #tpu.memory_space<vmem>>, vector<1x16x64xf32>
    %3 = vector.shape_cast %2 : vector<1x16x64xf32> to vector<16x64xf32>
    %c0_5 = arith.constant 0 : index
    %c0_6 = arith.constant 0 : index
    %c0_7 = arith.constant 0 : index
    %4 = vector.load %arg3[%c0_5, %c0_6, %c0_7] : memref<1x4x512xf32, #tpu.memory_space<vmem>>, vector<1x4x512xf32>
    %5 = vector.shape_cast %4 : vector<1x4x512xf32> to vector<4x512xf32>
    %c0_8 = arith.constant 0 : index
    %c0_9 = arith.constant 0 : index
    %c0_10 = arith.constant 0 : index
    %6 = vector.load %arg4[%c0_8, %c0_9, %c0_10] : memref<1x4x512xf32, #tpu.memory_space<vmem>>, vector<1x4x512xf32>
    %7 = vector.shape_cast %6 : vector<1x4x512xf32> to vector<4x512xf32>
    %8 = arith.subf %1, %3 : vector<16x64xf32>
    %9 = arith.subf %5, %7 : vector<4x512xf32>
    %10 = arith.mulf %8, %8 : vector<16x64xf32>
    %11 = vector.shape_cast %10 : vector<16x64xf32> to vector<1x16x64xf32>
    %cst = arith.constant dense<0.000000e+00> : vector<1xf32>
    %12 = vector.multi_reduction <add>, %11, %cst [1, 2] : vector<1x16x64xf32> to vector<1xf32>
    %13 = vector.shape_cast %12 : vector<1xf32> to vector<1x1x1xf32>
    %14 = vector.extract %13[0, 0, 0] : f32 from vector<1x1x1xf32>
    %15 = arith.mulf %9, %9 : vector<4x512xf32>
    %16 = vector.shape_cast %15 : vector<4x512xf32> to vector<1x4x512xf32>
    %cst_11 = arith.constant dense<0.000000e+00> : vector<1xf32>
    %17 = vector.multi_reduction <add>, %16, %cst_11 [1, 2] : vector<1x4x512xf32> to vector<1xf32>
    %18 = vector.shape_cast %17 : vector<1xf32> to vector<1x1x1xf32>
    %19 = vector.extract %18[0, 0, 0] : f32 from vector<1x1x1xf32>
    %20 = arith.addf %14, %19 : f32
    %c0_12 = arith.constant 0 : index
    %c0_13 = arith.constant 0 : index
    %21 = memref.load %arg7[%c0_12, %c0_13] : memref<1x1xf32, #tpu.memory_space<smem>>
    memref.store %20, %arg7[%c0_12, %c0_13] : memref<1x1xf32, #tpu.memory_space<smem>>
    %22 = arith.mulf %1, %1 : vector<16x64xf32>
    %23 = arith.mulf %3, %3 : vector<16x64xf32>
    %24 = arith.mulf %1, %3 : vector<16x64xf32>
    %25 = tpu.concatenate %1, %3, %22, %23, %24 in 1 : vector<16x64xf32>, vector<16x64xf32>, vector<16x64xf32>, vector<16x64xf32>, vector<16x64xf32> -> vector<16x320xf32>
    %c0_14 = arith.constant 0 : index
    %c0_15 = arith.constant 0 : index
    %26 = vector.load %arg5[%c0_14, %c0_15] : memref<8x16xf32, #tpu.memory_space<vmem>>, vector<8x16xf32>
    %cst_16 = arith.constant dense<0.000000e+00> : vector<8x320xf32>
    %27 = tpu.matmul %26, %25, %cst_16 {dimension_numbers = #tpu.dot_dimension_numbers<[1], [0], [0], [1], [0, 0, 1, 1], [], []>} : vector<8x16xf32>, vector<16x320xf32>, vector<8x320xf32> -> vector<8x320xf32>
    %c0_17 = arith.constant 0 : index
    %c0_18 = arith.constant 0 : index
    %28 = vector.load %arg6[%c0_17, %c0_18] : memref<320x120xf32, #tpu.memory_space<vmem>>, vector<320x120xf32>
    %cst_19 = arith.constant dense<0.000000e+00> : vector<8x120xf32>
    %29 = tpu.matmul %27, %28, %cst_19 {dimension_numbers = #tpu.dot_dimension_numbers<[1], [0], [0], [1], [0, 0, 1, 1], [], []>} : vector<8x320xf32>, vector<320x120xf32>, vector<8x120xf32> -> vector<8x120xf32>
    %30 = vector.extract_strided_slice %29 {offsets = [0, 0], sizes = [8, 24], strides = [1, 1]} : vector<8x120xf32> to vector<8x24xf32>
    %31 = vector.extract_strided_slice %29 {offsets = [0, 24], sizes = [8, 24], strides = [1, 1]} : vector<8x120xf32> to vector<8x24xf32>
    %32 = vector.extract_strided_slice %29 {offsets = [0, 48], sizes = [8, 24], strides = [1, 1]} : vector<8x120xf32> to vector<8x24xf32>
    %33 = vector.extract_strided_slice %29 {offsets = [0, 72], sizes = [8, 24], strides = [1, 1]} : vector<8x120xf32> to vector<8x24xf32>
    %34 = vector.extract_strided_slice %29 {offsets = [0, 96], sizes = [8, 24], strides = [1, 1]} : vector<8x120xf32> to vector<8x24xf32>
    %35 = arith.mulf %30, %30 : vector<8x24xf32>
    %36 = arith.mulf %31, %31 : vector<8x24xf32>
    %37 = arith.mulf %30, %31 : vector<8x24xf32>
    %38 = arith.subf %32, %35 : vector<8x24xf32>
    %39 = arith.subf %33, %36 : vector<8x24xf32>
    %40 = arith.subf %34, %37 : vector<8x24xf32>
    %cst_20 = arith.constant 2.000000e+00 : f32
    %41 = vector.broadcast %cst_20 : f32 to vector<8x24xf32>
    %42 = arith.mulf %41, %40 : vector<8x24xf32>
    %cst_21 = arith.constant 8.99999984E-4 : f32
    %43 = vector.broadcast %cst_21 : f32 to vector<8x24xf32>
    %44 = arith.addf %42, %43 : vector<8x24xf32>
    %45 = arith.addf %38, %39 : vector<8x24xf32>
    %cst_22 = arith.constant 8.99999984E-4 : f32
    %46 = vector.broadcast %cst_22 : f32 to vector<8x24xf32>
    %47 = arith.addf %45, %46 : vector<8x24xf32>
    %48 = arith.divf %44, %47 : vector<8x24xf32>
    %cst_23 = arith.constant 2.000000e+00 : f32
    %49 = vector.broadcast %cst_23 : f32 to vector<8x24xf32>
    %50 = arith.mulf %49, %37 : vector<8x24xf32>
    %cst_24 = arith.constant 9.99999974E-5 : f32
    %51 = vector.broadcast %cst_24 : f32 to vector<8x24xf32>
    %52 = arith.addf %50, %51 : vector<8x24xf32>
    %53 = arith.addf %35, %36 : vector<8x24xf32>
    %cst_25 = arith.constant 9.99999974E-5 : f32
    %54 = vector.broadcast %cst_25 : f32 to vector<8x24xf32>
    %55 = arith.addf %53, %54 : vector<8x24xf32>
    %56 = arith.divf %52, %55 : vector<8x24xf32>
    %57 = arith.mulf %56, %48 : vector<8x24xf32>
    %58 = tpu.iota {dimensions = array<i32: 0>} : vector<8x24xi32>
    %59 = tpu.iota {dimensions = array<i32: 1>} : vector<8x24xi32>
    %c4_i32 = arith.constant 4 : i32
    %60 = arith.muli %arg0, %c4_i32 : i32
    %c4_i32_26 = arith.constant 4 : i32
    %61 = arith.subi %c4_i32_26, %60 : i32
    %c4_i32_27 = arith.constant 4 : i32
    %62 = arith.minsi %61, %c4_i32_27 : i32
    %c6_i32 = arith.constant 6 : i32
    %63 = arith.muli %62, %c6_i32 : i32
    %c6_i32_28 = arith.constant 6 : i32
    %64 = vector.broadcast %c6_i32_28 : i32 to vector<8x24xi32>
    %65 = arith.cmpi slt, %58, %64 : vector<8x24xi32>
    %66 = vector.broadcast %63 : i32 to vector<8x24xi32>
    %67 = arith.cmpi slt, %59, %66 : vector<8x24xi32>
    %68 = arith.andi %65, %67 : vector<8x24xi1>
    %cst_29 = arith.constant 0.000000e+00 : f32
    %69 = vector.broadcast %cst_29 : f32 to vector<8x24xf32>
    %70 = arith.select %68, %57, %69 : vector<8x24xi1>, vector<8x24xf32>
    %71 = vector.shape_cast %70 : vector<8x24xf32> to vector<1x8x24xf32>
    %cst_30 = arith.constant dense<0.000000e+00> : vector<1xf32>
    %72 = vector.multi_reduction <add>, %71, %cst_30 [1, 2] : vector<1x8x24xf32> to vector<1xf32>
    %73 = vector.shape_cast %72 : vector<1xf32> to vector<1x1x1xf32>
    %74 = vector.extract %73[0, 0, 0] : f32 from vector<1x1x1xf32>
    %c0_31 = arith.constant 0 : index
    %c0_32 = arith.constant 0 : index
    %75 = memref.load %arg8[%c0_31, %c0_32] : memref<1x1xf32, #tpu.memory_space<smem>>
    memref.store %74, %arg8[%c0_31, %c0_32] : memref<1x1xf32, #tpu.memory_space<smem>>
    return
  }
  func.func @transform_0(%arg0: i32) -> (i32, i32, i32) {
    %c0_i32 = arith.constant 0 : i32
    %c0_i32_0 = arith.constant 0 : i32
    %c0_i32_1 = arith.constant 0 : i32
    return %arg0, %c0_i32, %c0_i32_0 : i32, i32, i32
  }
  func.func @transform_1(%arg0: i32) -> (i32, i32, i32) {
    %c0_i32 = arith.constant 0 : i32
    %c0_i32_0 = arith.constant 0 : i32
    %c0_i32_1 = arith.constant 0 : i32
    return %arg0, %c0_i32, %c0_i32_0 : i32, i32, i32
  }
  func.func @transform_2(%arg0: i32) -> (i32, i32, i32) {
    %c0_i32 = arith.constant 0 : i32
    %c0_i32_0 = arith.constant 0 : i32
    %c0_i32_1 = arith.constant 0 : i32
    return %arg0, %c0_i32, %c0_i32_0 : i32, i32, i32
  }
  func.func @transform_3(%arg0: i32) -> (i32, i32, i32) {
    %c0_i32 = arith.constant 0 : i32
    %c0_i32_0 = arith.constant 0 : i32
    %c0_i32_1 = arith.constant 0 : i32
    return %arg0, %c0_i32, %c0_i32_0 : i32, i32, i32
  }
  func.func @transform_4(%arg0: i32) -> (i32, i32) {
    %c0_i32 = arith.constant 0 : i32
    %c0_i32_0 = arith.constant 0 : i32
    %c0_i32_1 = arith.constant 0 : i32
    return %c0_i32, %c0_i32_0 : i32, i32
  }
  func.func @transform_5(%arg0: i32) -> (i32, i32) {
    %c0_i32 = arith.constant 0 : i32
    %c0_i32_0 = arith.constant 0 : i32
    %c0_i32_1 = arith.constant 0 : i32
    return %c0_i32, %c0_i32_0 : i32, i32
  }
  func.func @transform_6(%arg0: i32) -> (i32, i32) {
    %c0_i32 = arith.constant 0 : i32
    %c0_i32_0 = arith.constant 0 : i32
    return %arg0, %c0_i32 : i32, i32
  }
  func.func @transform_7(%arg0: i32) -> (i32, i32) {
    %c0_i32 = arith.constant 0 : i32
    %c0_i32_0 = arith.constant 0 : i32
    return %arg0, %c0_i32 : i32, i32
  }
}

</mosaic_0001>

<bundles_post_ra>
// kernel: tpu_custom_call.1
= control target key start
LH: loop header
LB: loop body
LE: loop exit
PB: predicated region body
PF: predicated region fallthrough
CT: control target
= control target key end

     0   :  { %13 = vsyncpa [#allocation3], 0  ;;  %s855_s0 = inlined_call_operand.hbm [shape: f32[1,16,64], index: 0, kind: input, shape index: {}]   ;;  %s856_s1 = inlined_call_operand.hbm [shape: f32[1,16,64], index: 1, kind: input, shape index: {}]   ;;  %s857_s2 = inlined_call_operand.hbm [shape: f32[1,4,512], index: 2, kind: input, shape index: {}]   ;;  %s858_s3 = inlined_call_operand.hbm [shape: f32[1,4,512], index: 3, kind: input, shape index: {}]   ;;  %s859_s4 = inlined_call_operand.hbm [shape: f32[8,16], index: 4, kind: input, shape index: {}]   ;;  %s860_s5 = inlined_call_operand.hbm [shape: f32[320,120], index: 5, kind: input, shape index: {}]   ;;  %s861_s6 = inlined_call_operand.hbm [shape: f32[1,1], index: 6, kind: output, shape index: {0}]   ;;  %s862_s7 = inlined_call_operand.hbm [shape: f32[1,1], index: 7, kind: output, shape index: {1}]  }
   0x1   :  { %14 = vsyncpa [#allocation6], 0 }
   0x2   :  { %15 = vsyncpa [#allocation9], 0 }
   0x3   :  { %16 = vsyncpa [#allocation12], 0 }
   0x4   :  { %17 = vsyncpa [#allocation4], 0 }
   0x5   :  { %18 = vsyncpa [#allocation15], 0  ;;  %s36_s26 = sshll.u32 %s856_s1, 4  ;;  %s720_s27 = smov [#allocation5]   ;;  %s37_s26 = int_to_ptr.hbm [resolvable:$true] %s36_s26 }
   0x6   :  { %s38_s28 = sshll.u32 %s720_s27, 4  ;;  %s61_s8 = sshll.u32 %s858_s3, 4  ;;  %s39_s28 = int_to_ptr.vmem [resolvable:$true] %s38_s28  ;;  %s62_s8 = int_to_ptr.hbm [resolvable:$true] %s61_s8 }
   0x7   :  { %s721_s9 = smov 128   ;;  %s722_s10 = smov 8  }
   0x8   :  { %44 = dma.hbm_to_vmem [thread:$0]  %s37_s26, 256, %s39_s28, [#allocation6], %s721_s9, %s721_s9, %s722_s10  }
   0x9   :  { %s723_s11 = smov [#allocation8]   ;;  %s23_s1 = sshll.u32 %s855_s0, 4  ;;  %s24_s1 = int_to_ptr.hbm [resolvable:$true] %s23_s1 }
   0xa   :  { %s63_s12 = sshll.u32 %s723_s11, 4  ;;  %s50_s3 = sshll.u32 %s857_s2, 4  ;;  %s64_s12 = int_to_ptr.vmem [resolvable:$true] %s63_s12  ;;  %s51_s3 = int_to_ptr.hbm [resolvable:$true] %s50_s3 }
   0xb   :  { %66 = dma.hbm_to_vmem [thread:$0]  %s62_s8, 256, %s64_s12, [#allocation9]  }
   0xc   :  { %s724_s17 = smov [#allocation2]   ;;  %s725_s19 = smov [#allocation7]  }
   0xd   :  { %s25_s18 = sshll.u32 %s724_s17, 4  ;;  %s52_s20 = sshll.u32 %s725_s19, 4  ;;  %s26_s18 = int_to_ptr.vmem [resolvable:$true] %s25_s18  ;;  %s53_s20 = int_to_ptr.vmem [resolvable:$true] %s52_s20 }
   0xe   :  { %31 = dma.hbm_to_vmem [thread:$0]  %s24_s1, 256, %s26_s18, [#allocation3], %s721_s9, %s721_s9, %s722_s10  }
   0xf   :  { %s72_s0 = sshll.u32 %s859_s4, 4  ;;  %s82_s2 = sshll.u32 %s860_s5, 4  ;;  %s73_s0 = int_to_ptr.hbm [resolvable:$true] %s72_s0  ;;  %s83_s2 = int_to_ptr.hbm [resolvable:$true] %s82_s2 }
  0x10   :  { %55 = dma.hbm_to_vmem [thread:$0]  %s51_s3, 256, %s53_s20, [#allocation6]  }
  0x11   :  { %s726_s25 = smov [#allocation10]   ;;  %s727_s27 = smov [#allocation11]  }
  0x12   :  { %s74_s26 = sshll.u32 %s726_s25, 4  ;;  %s84_s28 = sshll.u32 %s727_s27, 4  ;;  %s75_s26 = int_to_ptr.vmem [resolvable:$true] %s74_s26  ;;  %s85_s28 = int_to_ptr.vmem [resolvable:$true] %s84_s28 }
  0x13   :  { %77 = dma.hbm_to_vmem [thread:$0]  %s73_s0, 128, %s75_s26, [#allocation9]  }
  0x14   :  { %90 = dma.hbm_to_vmem [thread:$0]  %s83_s2, 5120, %s85_s28, [#allocation12], %s721_s9, %s721_s9, %s722_s10  }
  0x15   :  { %708 = dma.done.wait [#allocation3], 256  }
  0x16   :  { %709 = vsyncadd [#allocation3], 4294967040 }
  0x17   :  { %710 = dma.done.wait [#allocation6], 512  }
  0x18   :  { %711 = vsyncadd [#allocation6], 4294966784 }
  0x19   :  { %712 = dma.done.wait [#allocation9], 384  }
  0x1a   :  { %713 = vsyncadd [#allocation9], 4294966912 }
  0x1b   :  { %714 = dma.done.wait [#allocation12], 5120  }
  0x1c   :  { %715 = vsyncadd [#allocation12], 4294962176  ;;  %v802_v0 = vld [vmem:[#allocation5] sm:$0xff]  ;;  %v804_v1 = vld [vmem:[#allocation5 + $0x8] sm:$0xff]  ;;  %s728_s4 = smov 64   ;;  %vm129_vm0 = vcmask 523264  }
  0x1d   :  { %v526_v2 = vpack.i.bf16 %v802_v0, %v804_v1  ;;  %v179_v3 = vmul.f32 %v802_v0, %v802_v0  ;;  %v180_v4 = vmul.f32 %v804_v1, %v804_v1  ;;  %v283_v6 = vld [vmem:[#allocation11 + $0x78] sm:$0xff]  ;;  %v282_v7 = vld [vmem:[#allocation11 + $0x70] sm:$0xff]  ;;  %v281_v9 = vld [vmem:[#allocation11 + $0x68] sm:$0xff]  ;;  %vm204_vm1 = vcmask 130048   ;;  %s729_s5 = smov 104   ;;  %s730_s29 = smov 48  }
  0x1e   :  { %311 = vmatpush.msra.mxu3 %v283_v6  ;;  %v299_v8 = vld [vmem:[#allocation11 + $0xf8] sm:$0xff]  ;;  %v298_v10 = vld [vmem:[#allocation11 + $0xf0] sm:$0xff]  ;;  %v297_v11 = vld [vmem:[#allocation11 + $0xe8] sm:$0xff]  ;;  %s731_s30 = smov 96   ;;  %vm157_vm2 = vcmask 1043456   ;;  %s732_s8 = smov 32  }
  0x1f   :  { %527 = vrot.lane.b32.xlu0 %v526_v2, %s728_s4  ;;  %v531_v5 = vpack.i.bf16 %v179_v3, %v180_v4  ;;  %331 = vmatpush.msra.mxu0 %v299_v8  ;;  %v280_v12 = vld [vmem:[#allocation11 + $0x60] sm:$0xff]  ;;  %v279_v14 = vld [vmem:[#allocation11 + $0x58] sm:$0xff]  ;;  %v278_v16 = vld [vmem:[#allocation11 + $0x50] sm:$0xff]  ;;  %vm455_vm14 = vcmask 195584   ;;  %s473_s11 = sshll.u32 %s861_s6, 4  ;;  %s733_s1 = smov [#allocation13]   ;;  %s474_s11 = int_to_ptr.hbm [resolvable:$true] %s473_s11 }
  0x20   :  { %312 = vmatpush.msra.mxu3 %v282_v7  ;;  %v296_v13 = vld [vmem:[#allocation11 + $0xe0] sm:$0xff]  ;;  %v295_v15 = vld [vmem:[#allocation11 + $0xd8] sm:$0xff]  ;;  %v294_v17 = vld [vmem:[#allocation11 + $0xd0] sm:$0xff]  ;;  %s482_s3 = sshll.u32 %s862_s7, 4  ;;  %s734_s18 = smov [#allocation14]   ;;  %s483_s3 = int_to_ptr.hbm [resolvable:$true] %s482_s3 }
  0x21   :  { %332 = vmatpush.msra.mxu0 %v298_v10  ;;  %v277_v18 = vld [vmem:[#allocation11 + $0x48] sm:$0xff]  ;;  %v276_v20 = vld [vmem:[#allocation11 + $0x40] sm:$0xff]  ;;  %v275_v22 = vld [vmem:[#allocation11 + $0x38] sm:$0xff] }
  0x22   :  { %313 = vmatpush.msra.mxu3 %v281_v9  ;;  %v293_v19 = vld [vmem:[#allocation11 + $0xc8] sm:$0xff]  ;;  %v292_v21 = vld [vmem:[#allocation11 + $0xc0] sm:$0xff]  ;;  %v291_v23 = vld [vmem:[#allocation11 + $0xb8] sm:$0xff] }
  0x23   :  { %333 = vmatpush.msra.mxu0 %v297_v11  ;;  %v274_v24 = vld [vmem:[#allocation11 + $0x30] sm:$0xff]  ;;  %v812_v26 = vld [vmem:[#allocation2 + $0x8] sm:$0xff]  ;;  %v273_v30 = vld [vmem:[#allocation11 + $0x28] sm:$0xff] }
  0x24   :  { %314 = vmatpush.msra.mxu3 %v280_v12  ;;  %v290_v27 = vld [vmem:[#allocation11 + $0xb0] sm:$0xff]  ;;  %v814_v31 = vld [vmem:[#allocation2] sm:$0xff]  ;;  %v289_v32 = vld [vmem:[#allocation11 + $0xa8] sm:$0xff]  ;;  %v182_v36 = vmul.f32 %v804_v1, %v812_v26  ;;  %v178_v41 = vmul.f32 %v812_v26, %v812_v26 }
  0x25   :  { %334 = vmatpush.msra.mxu0 %v296_v13  ;;  %v272_v34 = vld [vmem:[#allocation11 + $0x20] sm:$0xff]  ;;  %v203_v35 = vld [vmem:[#allocation10] sm:$0xff]  ;;  %v181_v40 = vmul.f32 %v802_v0, %v814_v31  ;;  %v177_v42 = vmul.f32 %v814_v31, %v814_v31  ;;  %v270_v43 = vld [vmem:[#allocation11 + $0x10] sm:$0xff] }
  0x26   :  { %315 = vmatpush.msra.mxu3 %v279_v14  ;;  %v288_v37 = vld [vmem:[#allocation11 + $0xa0] sm:$0xff]  ;;  %v271_v39 = vld [vmem:[#allocation11 + $0x18] sm:$0xff]  ;;  %v269_v47 = vld [vmem:[#allocation11 + $0x8] sm:$0xff] }
  0x27   :  { %532 = vrot.lane.b32.xlu0 %v531_v5, %s728_s4  ;;  %335 = vmatpush.msra.mxu0 %v295_v15  ;;  %v307_v50 = vld [vmem:[#allocation11 + $0x138] sm:$0xff]  ;;  %v306_v51 = vld [vmem:[#allocation11 + $0x130] sm:$0xff]  ;;  %v305_v52 = vld [vmem:[#allocation11 + $0x128] sm:$0xff] }
  0x28   :  { %316 = vmatpush.msra.mxu3 %v278_v16  ;;  %v268_v53 = vld [vmem:[#allocation11] sm:$0xff]  ;;  %v287_v54 = vld [vmem:[#allocation11 + $0x98] sm:$0xff]  ;;  %v286_v56 = vld [vmem:[#allocation11 + $0x90] sm:$0xff] }
  0x29   :  { %336 = vmatpush.msra.mxu0 %v294_v17  ;;  %v304_v55 = vld [vmem:[#allocation11 + $0x120] sm:$0xff]  ;;  %v303_v57 = vld [vmem:[#allocation11 + $0x118] sm:$0xff]  ;;  %v285_v58 = vld [vmem:[#allocation11 + $0x88] sm:$0xff] }
  0x2a   :  { %317 = vmatpush.msra.mxu3 %v277_v18  ;;  %v302_v59 = vld [vmem:[#allocation11 + $0x110] sm:$0xff]  ;;  %v284_v60 = vld [vmem:[#allocation11 + $0x80] sm:$0xff]  ;;  %v301_v61 = vld [vmem:[#allocation11 + $0x108] sm:$0xff] }
  0x2b   :  { %337 = vmatpush.msra.mxu0 %v293_v19  ;;  %v300_v62 = vld [vmem:[#allocation11 + $0x100] sm:$0xff]  ;;  %v119_v17 = vld [vmem:[#allocation7] sm:$0xff]  ;;  %v121_v19 = vld [vmem:[#allocation8] sm:$0xff] }
  0x2c   :  { %318 = vmatpush.msra.mxu3 %v276_v20  ;;  %v120_v18 = vld [vmem:[#allocation7 + $0x8] sm:$0xff]  ;;  %v123_v20 = vsub.f32 %v814_v31, %v802_v0 }
  0x2d   :  { %338 = vmatpush.msra.mxu0 %v292_v21  ;;  %v124_v21 = vsub.f32 %v812_v26, %v804_v1 }
  0x2e   :  { %319 = vmatpush.msra.mxu3 %v275_v22  ;;  %v122_v22 = vld [vmem:[#allocation8 + $0x8] sm:$0xff] }
  0x2f   :  { %339 = vmatpush.msra.mxu0 %v291_v23  ;;  %v125_v23 = vsub.f32 %v119_v17, %v121_v19 }
  0x30   :  { %320 = vmatpush.msra.mxu3 %v274_v24  ;;  %v126_v24 = vsub.f32 %v120_v18, %v122_v22 }
  0x31   :  { %340 = vmatpush.msra.mxu0 %v290_v27  ;;  %v128_v27 = vmul.f32 %v124_v21, %v124_v21 }
  0x32   :  { %321 = vmatpush.msra.mxu3 %v273_v30 }
  0x33   :  { %341 = vmatpush.msra.mxu0 %v289_v32  ;;  %v131_v32 = vsel %vm129_vm0, %v128_v27, 0.0 }
  0x34   :  { %322 = vmatpush.msra.mxu3 %v272_v34 }
  0x35   :  { %342 = vmatpush.msra.mxu0 %v288_v37 }
  0x36   :  { %323 = vmatpush.msra.mxu3 %v271_v39 }
  0x37   :  { %343 = vmatpush.msra.mxu0 %v287_v54 }
  0x38   :  { %324 = vmatpush.msra.mxu3 %v270_v43 }
  0x39   :  { %344 = vmatpush.msra.mxu0 %v286_v56 }
  0x3a   :  { %325 = vmatpush.msra.mxu3 %v269_v47 }
  0x3b   :  { %345 = vmatpush.msra.mxu0 %v285_v58 }
  0x3c   :  { %326 = vmatpush.msra.mxu3 %v268_v53 }
  0x3d   :  { %346 = vmatpush.msra.mxu0 %v284_v60 }
  0x91   :  { %v528_v25 = vpop.permute.xlu0 %527 }
  0x92   :  { %v530_v28 = vunpack.i.h.bf16 %v528_v25  ;;  %v529_v29 = vunpack.i.l.bf16 %v528_v25  ;;  %v127_v25 = vmul.f32 %v123_v20, %v123_v20 }
  0x94   :  { %v200_v33 = vsel %vm129_vm0, %v812_v26, %v529_v29  ;;  %v199_v38 = vsel %vm129_vm0, %v814_v31, %v530_v28  ;;  %v142_v28 = vmul.f32 %v125_v23, %v125_v23  ;;  %v143_v29 = vmul.f32 %v126_v24, %v126_v24 }
  0x95   :  { %222 = vmatpush.msra.mxu2 %v200_v33  ;;  %v130_v30 = vsel %vm129_vm0, %v127_v25, 0.0 }
  0x96   :  { %146 = vst [vmem:[#allocation1] ss:$2 sm:$0xff] %v142_v28  ;;  %v132_v33 = vadd.f32 %v131_v32, %v130_v30 }
  0x97   :  { %223 = vmatpush.msra.mxu2 %v199_v38  ;;  %148 = vst [vmem:[#allocation1 + $0x10] ss:$2 sm:$0xff] %v143_v29 }
  0x98   :  { %501 = vmatmul.msk.f32.vlgmr.msra.gmra.mxu2 %vm204_vm1, %v203_v35 }
  0x99   :  { %262 = vmatpush.msrb.mxu2 %v182_v36  ;;  %v533_v44 = vpop.permute.xlu0 %532 }
  0x9a   :  { %v535_v45 = vunpack.i.h.bf16 %v533_v44  ;;  %v534_v46 = vunpack.i.l.bf16 %v533_v44 }
  0x9b   :  { %263 = vmatpush.msrb.mxu2 %v181_v40 }
  0x9c   :  { %v202_v48 = vsel %vm129_vm0, %v178_v41, %v534_v46  ;;  %v201_v49 = vsel %vm129_vm0, %v177_v42, %v535_v45 }
  0x9d   :  { %242 = vmatpush.msra.mxu1 %v202_v48  ;;  %v149_v31 = vld.sshfl [vmem:[#allocation1] sm:$0xff pattern:$0x75316420]  ;;  %v150_v34 = vld.sshfl [vmem:[#allocation1 + $0x8] sm:$0xff pattern:$0x75316420] }
  0x9e   :  { %v151_v1 = vld.sshfl [vmem:[#allocation1 + $0x10] sm:$0xff pattern:$0x75316420]  ;;  %v152_v26 = vld.sshfl [vmem:[#allocation1 + $0x18] sm:$0xff pattern:$0x75316420] }
  0x9f   :  { %243 = vmatpush.msra.mxu1 %v201_v49  ;;  %v159_v36 = vsel %vm157_vm2, %v150_v34, 0.0  ;;  %v161_v37 = vsel %vm157_vm2, %v151_v1, 0.0  ;;  %v163_v39 = vsel %vm157_vm2, %v152_v26, 0.0 }
  0xa0   :  { %503 = vmatmul.msk.f32.vlgmr.msrb.gmra.mxu2 %vm204_vm1, %v203_v35  ;;  %502 = vmatmul.msk.f32.vlgmr.msra.gmra.mxu1 %vm204_vm1, %v203_v35  ;;  %v158_v35 = vsel %vm157_vm2, %v149_v31, 0.0 }
  0xa1   :  { %359 = vmatpush.msrb.mxu1 %v307_v50  ;;  %v160_v38 = vadd.f32 %v159_v36, %v158_v35 }
  0xa3   :  { %360 = vmatpush.msrb.mxu1 %v306_v51  ;;  %v162_v41 = vadd.f32 %v161_v37, %v160_v38 }
  0xa5   :  { %361 = vmatpush.msrb.mxu1 %v305_v52  ;;  %v164_v43 = vadd.f32 %v163_v39, %v162_v41 }
  0xa7   :  { %362 = vmatpush.msrb.mxu1 %v304_v55 }
  0xa9   :  { %363 = vmatpush.msrb.mxu1 %v303_v57 }
  0xab   :  { %364 = vmatpush.msrb.mxu1 %v302_v59 }
  0xad   :  { %365 = vmatpush.msrb.mxu1 %v301_v61 }
  0xaf   :  { %366 = vmatpush.msrb.mxu1 %v300_v62 }
 0x11b   :  { %v225_v63 = vpop.f32.mrf.mxu2 }
 0x11c   :  { %327 = vmatmul.f32.vlgmr.msra.gmra.mxu3 %v225_v63 }
 0x11d   :  { %v245_v2 = vpop.f32.mrf.mxu1 }
 0x11e   :  { %347 = vmatmul.f32.vlgmr.msra.gmra.mxu0 %v245_v2 }
 0x123   :  { %v265_v3 = vpop.f32.mrf.mxu2 }
 0x124   :  { %504 = vmatmul.msk.f32.vlgmr.msrb.gmra.mxu1 %vm129_vm0, %v265_v3  ;;  %v441_v3 = vlaneseq }
 0x19b   :  { %v348_v4 = vpop.f32.mrf.mxu0 }
 0x19f   :  { %v328_v5 = vpop.f32.mrf.mxu3 }
 0x1a0   :  { %v349_v6 = vadd.f32 %v348_v4, %v328_v5 }
 0x1a1   :  { %v368_v7 = vpop.f32.mrf.mxu1 }
 0x1a2   :  { %v369_v8 = vadd.f32 %v368_v7, %v349_v6 }
 0x1a4   :  { %373 = vrot.lane.b32.xlu2 %v369_v8, %s729_s5  ;;  %v834_v9 = vmul.f32 %v369_v8, %v369_v8 }
 0x1a6   :  { %378 = vrot.lane.b32.xlu1 %v834_v9, %s730_s29 }
 0x1fe   :  { %v374_v10 = vpop.permute.xlu2 %373 }
 0x1ff   :  { %v837_v11 = vmul.f32 %v374_v10, %v369_v8  ;;  %v444_v10 = vand.u32 127, %v441_v3 }
 0x201   :  { %383 = vrot.lane.b32.xlu0 %v837_v11, %s731_s30  ;;  %v414_v6 = vmul.f32 2.0, %v837_v11  ;;  %vm452_vm12 = vcmp.lt.s32.totalorder %v444_v10, 24 }
 0x218   :  { %v379_v12 = vpop.permute.xlu1 %378 }
 0x219   :  { %v381_v13 = vsub.f32 %v369_v8, %v379_v12 }
 0x21b   :  { %390 = vrot.lane.b32.xlu1 %v381_v13, %s729_s5 }
 0x223   :  { %416 = vrot.lane.b32.xlu1 %v834_v9, %s729_s5 }
 0x22b   :  { %133 = vadd.xlane.f32.xlu0 %v132_v33 }
 0x24d   :  { %165 = vadd.xlane.f32.xlu1 %v164_v43 }
 0x273   :  { %v384_v40 = vpop.permute.xlu0 %383 }
 0x274   :  { %v386_v44 = vsub.f32 %v369_v8, %v384_v40  ;;  %v442_v8 = vshrl.u32 %v441_v3, 7 }
 0x276   :  { %v387_v48 = vmul.f32 2.0, %v386_v44  ;;  %vm450_vm11 = vcmp.lt.s32.totalorder %v442_v8, 6 }
 0x277   :  { %vm453_vm13 = vmand %vm450_vm11, %vm452_vm12 }
 0x278   :  { %v388_v53 = vadd.f32 0.0009, %v387_v48 }
 0x28d   :  { %v391_v14 = vpop.permute.xlu1 %390 }
 0x28e   :  { %v393_v15 = vadd.f32 %v391_v14, %v381_v13  ;;  %v415_v13 = vadd.f32 0.0001, %v414_v6 }
 0x290   :  { %v394_v16 = vadd.f32 0.0009, %v393_v15 }
 0x292   :  { %396 = vrot.lane.b32.xlu2 %v394_v16, %s730_s29 }
 0x295   :  { %v417_v57 = vpop.permute.xlu1 %416 }
 0x296   :  { %v419_v58 = vadd.f32 %v417_v57, %v834_v9 }
 0x298   :  { %v420_v59 = vadd.f32 0.0001, %v419_v58 }
 0x29a   :  { %v432_v4 = vand.u32 2147483648, %v420_v59  ;;  %vm426_vm8 = vweird.f32 %v420_v59  ;;  %v430_v5 = vand.u32 2147483647, %v420_v59 }
 0x29c   :  { %v433_v12 = vor.u32 1.1754944e-38, %v432_v4  ;;  %vm431_vm10 = vcmp.eq.f32.partialorder %v430_v5, 8.507059e+37 }
 0x29e   :  { %v134_v20 = vpop.xlane.xlu0 %133 }
 0x29f   :  { %v135_v21 = vrot.slane %v134_v20, 4 }
 0x2a1   :  { %v136_v23 = vadd.f32 %v135_v21, %v134_v20 }
 0x2a3   :  { %v137_v25 = vrot.slane %v136_v23, 2 }
 0x2a5   :  { %v138_v28 = vadd.f32 %v137_v25, %v136_v23 }
 0x2a7   :  { %v139_v29 = vrot.slane %v138_v28, 1 }
 0x2a9   :  { %v140_v32 = vadd.f32 %v139_v29, %v138_v28 }
 0x2ab   :  { %505 = vpush %v140_v32 }
 0x2c0   :  { %v166_v19 = vpop.xlane.xlu1 %165 }
 0x2c1   :  { %v167_v11 = vrot.slane %v166_v19, 4 }
 0x2c3   :  { %v168_v22 = vadd.f32 %v167_v11, %v166_v19 }
 0x2c5   :  { %v169_v24 = vrot.slane %v168_v22, 2 }
 0x2c7   :  { %v170_v27 = vadd.f32 %v169_v24, %v168_v22 }
 0x2c9   :  { %v171_v30 = vrot.slane %v170_v27, 1 }
 0x2cb   :  { %v172_v33 = vadd.f32 %v171_v30, %v170_v27 }
 0x2cd   :  { %507 = vpush %v172_v33 }
 0x2dc   :  { %s506_s12 = spop %505 }
 0x2ec   :  { %v397_v0 = vpop.permute.xlu2 %396 }
 0x2ed   :  { %536 = vrcp.f32 %v397_v0  ;;  %v410_v47 = vand.u32 2147483648, %v397_v0  ;;  %v408_v50 = vand.u32 2147483647, %v397_v0  ;;  %vm404_vm4 = vweird.f32 %v397_v0 }
 0x2ee   :  { %538 = vrcp.f32 %v420_v59 }
 0x2ef   :  { %v411_v52 = vor.u32 1.1754944e-38, %v410_v47  ;;  %vm409_vm6 = vcmp.eq.f32.partialorder %v408_v50, 8.507059e+37 }
 0x2f3   :  { %v537_v42 = vpop.eup %536 }
 0x2f4   :  { %v400_v45 = vmul.f32 %v537_v42, %v397_v0  ;;  %vm405_vm3 = vweird.f32 %v537_v42  ;;  %v539_v60 = vpop.eup %538 }
 0x2f5   :  { %vm406_vm5 = vmor %vm404_vm4, %vm405_vm3  ;;  %v422_v61 = vmul.f32 %v539_v60, %v420_v59  ;;  %vm427_vm7 = vweird.f32 %v539_v60 }
 0x2f6   :  { %v401_v46 = vsub.f32 1.0, %v400_v45  ;;  %vm428_vm9 = vmor %vm426_vm8, %vm427_vm7 }
 0x2f7   :  { %v423_v62 = vsub.f32 1.0, %v422_v61 }
 0x2f8   :  { %v402_v49 = vmul.f32 %v537_v42, %v401_v46 }
 0x2f9   :  { %v424_v63 = vmul.f32 %v539_v60, %v423_v62 }
 0x2fa   :  { %v403_v51 = vadd.f32 %v537_v42, %v402_v49 }
 0x2fb   :  { %v425_v2 = vadd.f32 %v539_v60, %v424_v63 }
 0x2fc   :  { %v407_v54 = vsel %vm406_vm5, %v537_v42, %v403_v51 }
 0x2fd   :  { %v412_v55 = vsel %vm409_vm6, %v411_v52, %v407_v54  ;;  %v429_v7 = vsel %vm428_vm9, %v539_v60, %v425_v2 }
 0x2fe   :  { %v413_v56 = vmul.f32 %v412_v55, %v388_v53  ;;  %v434_v9 = vsel %vm431_vm10, %v433_v12, %v429_v7  ;;  %s508_s13 = spop %507 }
 0x2ff   :  { %v435_v14 = vmul.f32 %v434_v9, %v415_v13  ;;  %s174_s14 = sadd.f32 %s508_s13, %s506_s12 }
 0x300   :  { %437 = vrot.lane.b32.xlu2 %v413_v56, %s732_s8 }
 0x301   :  { %176 = sst [smem:[#allocation13]] %s174_s14 }
 0x302   :  { %476 = dma.smem_to_hbm %s733_s1, 16, %s474_s11, [#allocation4]  }
 0x35a   :  { %v438_v15 = vpop.permute.xlu2 %437 }
 0x35b   :  { %v440_v16 = vmul.f32 %v438_v15, %v435_v14 }
 0x35d   :  { %v454_v17 = vsel %vm453_vm13, %v440_v16, 0.0 }
 0x35e   :  { %v456_v18 = vsel %vm455_vm14, %v454_v17, 0.0 }
 0x35f   :  { %457 = vadd.xlane.f32.xlu2 %v456_v18 }
 0x3d2   :  { %v458_v0 = vpop.xlane.xlu2 %457 }
 0x3d3   :  { %v459_v31 = vrot.slane %v458_v0, 4 }
 0x3d5   :  { %v460_v34 = vadd.f32 %v459_v31, %v458_v0 }
 0x3d7   :  { %v461_v1 = vrot.slane %v460_v34, 2 }
 0x3d9   :  { %v462_v26 = vadd.f32 %v461_v1, %v460_v34 }
 0x3db   :  { %v463_v35 = vrot.slane %v462_v26, 1 }
 0x3dd   :  { %v464_v36 = vadd.f32 %v463_v35, %v462_v26 }
 0x3df   :  { %509 = vpush %v464_v36 }
 0x410   :  { %s510_s17 = spop %509 }
 0x411   :  { %467 = sst [smem:[#allocation14]] %s510_s17 }
 0x412   :  { %485 = dma.smem_to_hbm %s734_s18, 16, %s483_s3, [#allocation15]  }
 0x413   :  { %716 = dma.done.wait [#allocation4], 16  }
 0x414   :  { %717 = vsyncadd [#allocation4], 4294967280 }
 0x415   :  { %718 = dma.done.wait [#allocation15], 16  }
 0x416   :  { %719 = vsyncadd [#allocation15], 4294967280 }
 0x417   :  { %494 = sfence }
 0x418   :  { %495 = vsyncpa [#allocation3], 1 }
 0x419   :  { %496 = vsyncpa [#allocation6], 1 }
 0x41a   :  { %497 = vsyncpa [#allocation9], 1 }
 0x41b   :  { %498 = vsyncpa [#allocation12], 1 }
 0x41c   :  { %499 = vsyncpa [#allocation4], 1 }
 0x41d   :  { %500 = vsyncpa [#allocation15], 1 }

</bundles_post_ra>
